<compile_context>
chip_gen: v5e
topology: v5e:2x2
jax: 0.10.0
libtpu: 0.0.40
codegen_flags: <defaults>
</compile_context>

<pallas_src>
import functools

import jax
import jax.numpy as jnp
from jax import lax
from jax.experimental import pallas as pl
from jax.experimental.pallas import tpu as pltpu


def _round_up(x, m):
    return ((x + m - 1) // m) * m


def _genotype_loss_kernel(pred_ref, tgt_ref, w_ref, out_ref, num_acc, den_acc):
    i = pl.program_id(0)

    @pl.when(i == 0)
    def _():
        num_acc[...] = jnp.zeros_like(num_acc)
        den_acc[...] = jnp.zeros_like(den_acc)

    logits = pred_ref[...].astype(jnp.float32)          # (C, TILE_N)
    tgt = tgt_ref[...]                                   # (1, TILE_N) int32
    w = w_ref[...].astype(jnp.float32)                   # (C, 1)

    # class-id rows vs. broadcast targets: exactly one hit per valid column,
    # no hit for padded columns (target == -1).
    row = lax.broadcasted_iota(jnp.int32, logits.shape, 0)
    hit = row == tgt                                     # (C, TILE_N)

    # numerically-stable log-softmax over the (small) class/sublane axis.
    m = jnp.max(logits, axis=0, keepdims=True)           # (1, TILE_N)
    shifted = logits - m
    lse = jnp.log(jnp.sum(jnp.exp(shifted), axis=0, keepdims=True))  # (1, TILE_N)

    # fused gathers via masked selects (no dense one-hot multiply).
    picked = jnp.sum(jnp.where(hit, shifted, 0.0), axis=0, keepdims=True)  # (1,TILE_N)
    w_t = jnp.sum(jnp.where(hit, w, 0.0), axis=0, keepdims=True)           # (1,TILE_N)

    # per-tile partial sums (cross-lane reductions -> XLU), scalar accumulate.
    numer_tile = jnp.sum(w_t * (lse - picked), axis=1, keepdims=True)      # (1,1)
    denom_tile = jnp.sum(w_t, axis=1, keepdims=True)                       # (1,1)
    num_acc[...] += numer_tile
    den_acc[...] += denom_tile

    @pl.when(i == pl.num_programs(0) - 1)
    def _():
        # single scalar divide + unmasked (1,1) store at the very end.
        out_ref[...] = num_acc[...] / den_acc[...]


def genotype_loss(pred, target, class_weights=None, *, max_tile_n=32768):
    """Pallas equivalent of GenotypeLoss.forward(pred, target).

    pred: (N, C) logits (any float dtype), target: (N,) integer class ids.
    """
    n, c = pred.shape

    if class_weights is None:
        w = jnp.ones((c, 1), dtype=jnp.float32)
    else:
        w = jnp.asarray(class_weights, dtype=jnp.float32).reshape(c, 1)

    # Tile size: multiple of 128 lanes (samples), capped so double-buffered
    # (C, TILE_N) tiles stay far under the per-generation VMEM budget.
    tile_n = min(max_tile_n, _round_up(n, 128))
    n_pad = _round_up(n, tile_n)
    num_tiles = n_pad // tile_n

    # Lane-dense layout: classes -> sublanes (full dim), samples -> lanes.
    # Keep pred in its native dtype (no f32 upcast in the wrapper).
    pred_t = jnp.transpose(pred)                         # (C, N)
    tgt = target.astype(jnp.int32).reshape(1, n)         # (1, N)
    if n_pad != n:
        pad = n_pad - n
        pred_t = jnp.pad(pred_t, ((0, 0), (0, pad)))
        tgt = jnp.pad(tgt, ((0, 0), (0, pad)), constant_values=-1)  # zero weight

    out = pl.pallas_call(
        _genotype_loss_kernel,
        out_shape=jax.ShapeDtypeStruct((1, 1), jnp.float32),
        grid_spec=pltpu.PrefetchScalarGridSpec(
            num_scalar_prefetch=0,
            grid=(num_tiles,),
            in_specs=[
                pl.BlockSpec((c, tile_n), lambda i: (0, i)),   # logits tile
                pl.BlockSpec((1, tile_n), lambda i: (0, i)),   # targets tile
                pl.BlockSpec((c, 1), lambda i: (0, 0)),        # class weights
            ],
            out_specs=pl.BlockSpec((1, 1), lambda i: (0, 0)),  # resident scalar
            scratch_shapes=[
                pltpu.VMEM((1, 1), jnp.float32),               # numer accumulator
                pltpu.VMEM((1, 1), jnp.float32),               # denom accumulator
            ],
        ),
        compiler_params=pltpu.CompilerParams(
            dimension_semantics=("arbitrary",),
            vmem_limit_bytes=32 * 1024 * 1024,
        ),
    )(pred_t, tgt, w)
    return out[0, 0]


def _reference_loss(pred, target, class_weights=None):
    # pure-JAX reference of F.cross_entropy (mean reduction, optional weights)
    logp = jax.nn.log_softmax(pred.astype(jnp.float32), axis=-1)
    n, _ = pred.shape
    picked = logp[jnp.arange(n), target]
    if class_weights is None:
        return -jnp.mean(picked)
    w = jnp.asarray(class_weights, jnp.float32)[target]
    return jnp.sum(-w * picked) / jnp.sum(w)


if __name__ == "__main__":
    key = jax.random.PRNGKey(0)
    k_pred, k_tgt, k_pred2, k_tgt2 = jax.random.split(key, 4)

    # small, GenotypeLoss-shaped example: 4 genotype classes {0/0, 0/1, 1/1, ./.}
    batch, num_classes = 16, 4
    pred = jax.random.normal(k_pred, (batch, num_classes), dtype=jnp.float32)
    target = jax.random.randint(k_tgt, (batch,), 0, num_classes, dtype=jnp.int32)

    # unweighted (default GenotypeLoss construction)
    loss = jax.block_until_ready(genotype_loss(pred, target, class_weights=None))
    ref = _reference_loss(pred, target, class_weights=None)
    assert jnp.allclose(loss, ref, atol=1e-5, rtol=1e-5), (loss, ref)

    # weighted path
    weights = jnp.array([1.0, 2.0, 0.5, 1.5], dtype=jnp.float32)
    loss_w = jax.block_until_ready(genotype_loss(pred, target, weights))
    ref_w = _reference_loss(pred, target, weights)
    assert jnp.allclose(loss_w, ref_w, atol=1e-5, rtol=1e-5), (loss_w, ref_w)

    # multi-tile path (forces grid accumulation + padding with target = -1)
    batch2 = 300
    pred2 = jax.random.normal(k_pred2, (batch2, num_classes), dtype=jnp.float32)
    target2 = jax.random.randint(k_tgt2, (batch2,), 0, num_classes, dtype=jnp.int32)
    loss2 = jax.block_until_ready(
        genotype_loss(pred2, target2, weights, max_tile_n=128)
    )
    ref2 = _reference_loss(pred2, target2, weights)
    assert jnp.allclose(loss2, ref2, atol=1e-5, rtol=1e-5), (loss2, ref2)

    print("KERNEL_OK")
</pallas_src>

<mosaic_0001>
module attributes {stable_mosaic.version = 11 : i64} {
  func.func @_genotype_loss_kernel(%arg0: i32, %arg1: memref<4x128xf32, #tpu.memory_space<vmem>>, %arg2: memref<1x128xi32, #tpu.memory_space<vmem>>, %arg3: memref<4x1xf32, #tpu.memory_space<vmem>>, %arg4: memref<1x1xf32, #tpu.memory_space<vmem>>, %arg5: memref<1x1xf32, #tpu.memory_space<vmem>>, %arg6: memref<1x1xf32, #tpu.memory_space<vmem>>) attributes {dimension_semantics = [#tpu.dimension_semantics<arbitrary>], iteration_bounds = array<i64: 1>, scalar_prefetch = 0 : i64, scratch_operands = 2 : i64, tpu.core_type = #tpu.core_type<tc>, window_params = [{transform_indices = @transform_0, window_bounds = array<i64: 4, 128>}, {transform_indices = @transform_1, window_bounds = array<i64: 1, 128>}, {pipeline_mode = #tpu.pipeline_mode<synchronous>, transform_indices = @transform_2, window_bounds = array<i64: 4, 1>}, {pipeline_mode = #tpu.pipeline_mode<synchronous>, transform_indices = @transform_3, window_bounds = array<i64: 1, 1>}]} {
    %c0_i32 = arith.constant 0 : i32
    %0 = arith.cmpi eq, %arg0, %c0_i32 : i32
    %1 = arith.extui %0 : i1 to i32
    %c0_i32_0 = arith.constant 0 : i32
    %2 = arith.cmpi ne, %1, %c0_i32_0 : i32
    scf.if %2 {
      %cst_23 = arith.constant 0.000000e+00 : f32
      %42 = vector.broadcast %cst_23 : f32 to vector<1x1xf32>
      %c0_24 = arith.constant 0 : index
      %c0_25 = arith.constant 0 : index
      %43 = vector.load %arg5[%c0_24, %c0_25] : memref<1x1xf32, #tpu.memory_space<vmem>>, vector<1x1xf32>
      tpu.vector_store %arg5[%c0_24, %c0_25], %42 {strides = array<i32>} : memref<1x1xf32, #tpu.memory_space<vmem>>, vector<1x1xf32>,
      %cst_26 = arith.constant 0.000000e+00 : f32
      %44 = vector.broadcast %cst_26 : f32 to vector<1x1xf32>
      %c0_27 = arith.constant 0 : index
      %c0_28 = arith.constant 0 : index
      %45 = vector.load %arg6[%c0_27, %c0_28] : memref<1x1xf32, #tpu.memory_space<vmem>>, vector<1x1xf32>
      tpu.vector_store %arg6[%c0_27, %c0_28], %44 {strides = array<i32>} : memref<1x1xf32, #tpu.memory_space<vmem>>, vector<1x1xf32>,
    } else {
    }
    %c0 = arith.constant 0 : index
    %c0_1 = arith.constant 0 : index
    %3 = vector.load %arg1[%c0, %c0_1] : memref<4x128xf32, #tpu.memory_space<vmem>>, vector<4x128xf32>
    %c0_2 = arith.constant 0 : index
    %c0_3 = arith.constant 0 : index
    %4 = vector.load %arg2[%c0_2, %c0_3] : memref<1x128xi32, #tpu.memory_space<vmem>>, vector<1x128xi32>
    %c0_4 = arith.constant 0 : index
    %c0_5 = arith.constant 0 : index
    %5 = vector.load %arg3[%c0_4, %c0_5] : memref<4x1xf32, #tpu.memory_space<vmem>>, vector<4x1xf32>
    %6 = tpu.iota {dimensions = array<i32: 0>} : vector<4x128xi32>
    %7 = vector.broadcast %4 : vector<1x128xi32> to vector<4x128xi32>
    %8 = arith.cmpi eq, %6, %7 : vector<4x128xi32>
    %cst = arith.constant dense<0xFF800000> : vector<128xf32>
    %9 = vector.multi_reduction <maximumf>, %3, %cst [0] : vector<4x128xf32> to vector<128xf32>
    %10 = vector.shape_cast %9 : vector<128xf32> to vector<1x128xf32>
    %11 = vector.broadcast %10 : vector<1x128xf32> to vector<4x128xf32>
    %12 = arith.subf %3, %11 : vector<4x128xf32>
    %13 = math.exp %12 : vector<4x128xf32>
    %cst_6 = arith.constant dense<0.000000e+00> : vector<128xf32>
    %14 = vector.multi_reduction <add>, %13, %cst_6 [0] : vector<4x128xf32> to vector<128xf32>
    %15 = vector.shape_cast %14 : vector<128xf32> to vector<1x128xf32>
    %16 = math.log %15 : vector<1x128xf32>
    %cst_7 = arith.constant 0.000000e+00 : f32
    %17 = vector.broadcast %cst_7 : f32 to vector<4x128xf32>
    %18 = arith.select %8, %12, %17 : vector<4x128xi1>, vector<4x128xf32>
    %cst_8 = arith.constant dense<0.000000e+00> : vector<128xf32>
    %19 = vector.multi_reduction <add>, %18, %cst_8 [0] : vector<4x128xf32> to vector<128xf32>
    %20 = vector.shape_cast %19 : vector<128xf32> to vector<1x128xf32>
    %cst_9 = arith.constant 0.000000e+00 : f32
    %21 = vector.shape_cast %5 : vector<4x1xf32> to vector<4x1xf32>
    %22 = vector.broadcast %21 : vector<4x1xf32> to vector<4x128xf32>
    %23 = vector.broadcast %cst_9 : f32 to vector<4x128xf32>
    %24 = arith.select %8, %22, %23 : vector<4x128xi1>, vector<4x128xf32>
    %cst_10 = arith.constant dense<0.000000e+00> : vector<128xf32>
    %25 = vector.multi_reduction <add>, %24, %cst_10 [0] : vector<4x128xf32> to vector<128xf32>
    %26 = vector.shape_cast %25 : vector<128xf32> to vector<1x128xf32>
    %27 = arith.subf %16, %20 : vector<1x128xf32>
    %28 = arith.mulf %26, %27 : vector<1x128xf32>
    %cst_11 = arith.constant dense<0.000000e+00> : vector<1xf32>
    %29 = vector.multi_reduction <add>, %28, %cst_11 [1] : vector<1x128xf32> to vector<1xf32>
    %30 = vector.shape_cast %29 : vector<1xf32> to vector<1x1xf32>
    %cst_12 = arith.constant dense<0.000000e+00> : vector<1xf32>
    %31 = vector.multi_reduction <add>, %26, %cst_12 [1] : vector<1x128xf32> to vector<1xf32>
    %32 = vector.shape_cast %31 : vector<1xf32> to vector<1x1xf32>
    %c0_13 = arith.constant 0 : index
    %c0_14 = arith.constant 0 : index
    %33 = vector.load %arg5[%c0_13, %c0_14] : memref<1x1xf32, #tpu.memory_space<vmem>>, vector<1x1xf32>
    %34 = arith.addf %33, %30 : vector<1x1xf32>
    %c0_15 = arith.constant 0 : index
    %c0_16 = arith.constant 0 : index
    %35 = vector.load %arg5[%c0_15, %c0_16] : memref<1x1xf32, #tpu.memory_space<vmem>>, vector<1x1xf32>
    tpu.vector_store %arg5[%c0_15, %c0_16], %34 {strides = array<i32>} : memref<1x1xf32, #tpu.memory_space<vmem>>, vector<1x1xf32>,
    %c0_17 = arith.constant 0 : index
    %c0_18 = arith.constant 0 : index
    %36 = vector.load %arg6[%c0_17, %c0_18] : memref<1x1xf32, #tpu.memory_space<vmem>>, vector<1x1xf32>
    %37 = arith.addf %36, %32 : vector<1x1xf32>
    %c0_19 = arith.constant 0 : index
    %c0_20 = arith.constant 0 : index
    %38 = vector.load %arg6[%c0_19, %c0_20] : memref<1x1xf32, #tpu.memory_space<vmem>>, vector<1x1xf32>
    tpu.vector_store %arg6[%c0_19, %c0_20], %37 {strides = array<i32>} : memref<1x1xf32, #tpu.memory_space<vmem>>, vector<1x1xf32>,
    %c0_i32_21 = arith.constant 0 : i32
    %39 = arith.cmpi eq, %arg0, %c0_i32_21 : i32
    %40 = arith.extui %39 : i1 to i32
    %c0_i32_22 = arith.constant 0 : i32
    %41 = arith.cmpi ne, %40, %c0_i32_22 : i32
    scf.if %41 {
      %c0_23 = arith.constant 0 : index
      %c0_24 = arith.constant 0 : index
      %42 = vector.load %arg5[%c0_23, %c0_24] : memref<1x1xf32, #tpu.memory_space<vmem>>, vector<1x1xf32>
      %c0_25 = arith.constant 0 : index
      %c0_26 = arith.constant 0 : index
      %43 = vector.load %arg6[%c0_25, %c0_26] : memref<1x1xf32, #tpu.memory_space<vmem>>, vector<1x1xf32>
      %44 = arith.divf %42, %43 : vector<1x1xf32>
      %c0_27 = arith.constant 0 : index
      %c0_28 = arith.constant 0 : index
      %45 = vector.load %arg4[%c0_27, %c0_28] : memref<1x1xf32, #tpu.memory_space<vmem>>, vector<1x1xf32>
      tpu.vector_store %arg4[%c0_27, %c0_28], %44 {strides = array<i32>} : memref<1x1xf32, #tpu.memory_space<vmem>>, vector<1x1xf32>,
    } else {
    }
    return
  }
  func.func @transform_0(%arg0: i32) -> (i32, i32) {
    %c0_i32 = arith.constant 0 : i32
    %c0_i32_0 = arith.constant 0 : i32
    return %c0_i32, %arg0 : i32, i32
  }
  func.func @transform_1(%arg0: i32) -> (i32, i32) {
    %c0_i32 = arith.constant 0 : i32
    %c0_i32_0 = arith.constant 0 : i32
    return %c0_i32, %arg0 : i32, i32
  }
  func.func @transform_2(%arg0: i32) -> (i32, i32) {
    %c0_i32 = arith.constant 0 : i32
    %c0_i32_0 = arith.constant 0 : i32
    %c0_i32_1 = arith.constant 0 : i32
    return %c0_i32, %c0_i32_0 : i32, i32
  }
  func.func @transform_3(%arg0: i32) -> (i32, i32) {
    %c0_i32 = arith.constant 0 : i32
    %c0_i32_0 = arith.constant 0 : i32
    %c0_i32_1 = arith.constant 0 : i32
    return %c0_i32, %c0_i32_0 : i32, i32
  }
}

</mosaic_0001>

<bundles_post_ra>
// kernel: tpu_custom_call.1
= control target key start
LH: loop header
LB: loop body
LE: loop exit
PB: predicated region body
PF: predicated region fallthrough
CT: control target
= control target key end

     0   :  { %v157_v1 = vmov 0   ;;  %s201_s0 = inlined_call_operand.vmem [shape: f32[4,128], index: 0, kind: input, shape index: {}]   ;;  %s202_s1 = inlined_call_operand.vmem [shape: s32[1,128], index: 1, kind: input, shape index: {}]   ;;  %s203_s2 = inlined_call_operand.vmem [shape: f32[4,1], index: 2, kind: input, shape index: {}]   ;;  %s204_s3 = inlined_call_operand.hbm [shape: f32[1,1], index: 3, kind: output, shape index: {}]  }
   0x1   :  { %v24_v0 = vld [vmem:[%s203_s2] sm:$0xf]  ;;  %123 = vset.pattern.permute.xlu0 %v157_v1 }
   0x2   :  { %8 = vsyncpa [#allocation5], 0  ;;  %59 = vperm.xlu0 %123, %v24_v0   ;;  %vm29_vm0 = vcmask 1043456   ;;  %v22_v2 = vld [vmem:[%s201_s0] sm:$0xf]  ;;  %v25_v13 = vlaneseq  ;;  %vm19_vm2 = vcmask 0  }
   0x3   :  { %v30_v3 = vsel %vm29_vm0, %v22_v2, -inf  ;;  %v124_v16 = vld [vmem:[%s202_s1] ss:$0 sm:$0xff]  ;;  %v158_v44 = vmov 0.0   ;;  %s159_s0 = smov [#allocation4]   ;;  %s111_s19 = sshll.u32 %s204_s3, 4  ;;  %s112_s19 = int_to_ptr.hbm [resolvable:$true] %s111_s19 }
   0x4   :  { %v31_v4 = vrot.slane %v30_v3, 4  ;;  %v26_v15 = vshrl.u32 %v25_v13, 7  ;;  %21 = vst.msk [vmem:[#allocation3] sm:$0x1] %vm19_vm2, %v158_v44  ;;  %s109_s1 = sshll.u32 %s159_s0, 4  ;;  %s110_s1 = int_to_ptr.vmem [resolvable:$true] %s109_s1 }
   0x5   :  { %20 = vst.msk [vmem:[#allocation2] sm:$0x1] %vm19_vm2, %v158_v44 }
   0x6   :  { %v32_v5 = vmax.f32 %v30_v3, %v31_v4  ;;  %vm28_vm1 = vcmp.eq.s32.totalorder %v26_v15, %v124_v16 }
   0x8   :  { %v33_v6 = vrot.slane %v32_v5, 2 }
   0xa   :  { %v34_v7 = vmax.f32 %v32_v5, %v33_v6 }
   0xb   :  { %v80_v45 = vld [vmem:[#allocation3] sm:$0x1] }
   0xc   :  { %v35_v8 = vrot.slane %v34_v7, 1  ;;  %v76_v47 = vld [vmem:[#allocation2] sm:$0x1] }
   0xe   :  { %v36_v9 = vmax.f32 %v34_v7, %v35_v8 }
  0x10   :  { %v37_v10 = vsub.f32 %v22_v2, %v36_v9 }
  0x12   :  { %v38_v11 = vmul.f32 1.442695, %v37_v10  ;;  %v49_v19 = vsel %vm28_vm1, %v37_v10, 0.0 }
  0x13   :  { %v50_v21 = vsel %vm29_vm0, %v49_v19, 0.0 }
  0x14   :  { %125 = vpow2.f32 %v38_v11  ;;  %v51_v23 = vrot.slane %v50_v21, 4 }
  0x16   :  { %v52_v25 = vadd.f32 %v51_v23, %v50_v21 }
  0x18   :  { %v53_v27 = vrot.slane %v52_v25, 2 }
  0x1a   :  { %v126_v12 = vpop.eup %125  ;;  %v54_v28 = vadd.f32 %v53_v27, %v52_v25 }
  0x1b   :  { %v40_v14 = vsel %vm29_vm0, %v126_v12, 0.0 }
  0x1c   :  { %v41_v17 = vrot.slane %v40_v14, 4  ;;  %v55_v33 = vrot.slane %v54_v28, 1 }
  0x1e   :  { %v42_v18 = vadd.f32 %v41_v17, %v40_v14  ;;  %v56_v38 = vadd.f32 %v55_v33, %v54_v28 }
  0x20   :  { %v43_v20 = vrot.slane %v42_v18, 2 }
  0x22   :  { %v44_v22 = vadd.f32 %v43_v20, %v42_v18 }
  0x24   :  { %v45_v24 = vrot.slane %v44_v22, 1 }
  0x26   :  { %v46_v26 = vadd.f32 %v45_v24, %v44_v22 }
  0x28   :  { %127 = vlog2.f32 %v46_v26 }
  0x2e   :  { %v128_v34 = vpop.eup %127 }
  0x2f   :  { %v48_v37 = vmul.f32 0.6931472, %v128_v34 }
  0x31   :  { %v70_v41 = vsub.f32 %v48_v37, %v56_v38 }
  0x74   :  { %v60_v29 = vpop.permute.xlu0 %59 }
  0x75   :  { %v62_v30 = vsel %vm28_vm1, %v60_v29, 0.0 }
  0x76   :  { %v63_v31 = vsel %vm29_vm0, %v62_v30, 0.0 }
  0x77   :  { %v64_v32 = vrot.slane %v63_v31, 4 }
  0x79   :  { %v65_v35 = vadd.f32 %v64_v32, %v63_v31 }
  0x7b   :  { %v66_v36 = vrot.slane %v65_v35, 2 }
  0x7d   :  { %v67_v39 = vadd.f32 %v66_v36, %v65_v35 }
  0x7f   :  { %v68_v40 = vrot.slane %v67_v39, 1 }
  0x81   :  { %v69_v42 = vadd.f32 %v68_v40, %v67_v39 }
  0x83   :  { %74 = vadd.xlane.f32.xlu0 %v69_v42  ;;  %v71_v43 = vmul.f32 %v70_v41, %v69_v42 }
  0x85   :  { %72 = vadd.xlane.f32.xlu1 %v71_v43 }
  0xf6   :  { %v75_v46 = vpop.xlane.xlu0 %74 }
  0xf7   :  { %v81_v48 = vadd.f32 %v80_v45, %v75_v46 }
  0xf8   :  { %v73_v49 = vpop.xlane.xlu1 %72 }
  0xf9   :  { %82 = vst.msk [vmem:[#allocation3] sm:$0x1] %vm19_vm2, %v81_v48  ;;  %v77_v50 = vadd.f32 %v76_v47, %v73_v49 }
  0xfb   :  { %79 = vst.msk [vmem:[#allocation2] sm:$0x1] %vm19_vm2, %v77_v50 }
 0x100   :  { %v87_v51 = vld [vmem:[#allocation3] sm:$0x1] }
 0x101   :  { %129 = vrcp.f32 %v87_v51  ;;  %v99_v55 = vand.u32 2147483648, %v87_v51  ;;  %v97_v57 = vand.u32 2147483647, %v87_v51  ;;  %vm93_vm4 = vweird.f32 %v87_v51 }
 0x102   :  { %v86_v61 = vld [vmem:[#allocation2] sm:$0x1] }
 0x103   :  { %v100_v59 = vor.u32 1.1754944e-38, %v99_v55  ;;  %vm98_vm6 = vcmp.eq.f32.partialorder %v97_v57, 8.507059e+37 }
 0x107   :  { %v130_v52 = vpop.eup %129 }
 0x108   :  { %v89_v53 = vmul.f32 %v130_v52, %v87_v51  ;;  %vm94_vm3 = vweird.f32 %v130_v52 }
 0x109   :  { %vm95_vm5 = vmor %vm93_vm4, %vm94_vm3 }
 0x10a   :  { %v90_v54 = vsub.f32 1.0, %v89_v53 }
 0x10c   :  { %v91_v56 = vmul.f32 %v130_v52, %v90_v54 }
 0x10e   :  { %v92_v58 = vadd.f32 %v130_v52, %v91_v56 }
 0x110   :  { %v96_v60 = vsel %vm95_vm5, %v130_v52, %v92_v58 }
 0x111   :  { %v101_v62 = vsel %vm98_vm6, %v100_v59, %v96_v60 }
 0x112   :  { %v102_v63 = vmul.f32 %v101_v62, %v86_v61 }
 0x114   :  { %103 = vst.msk [vmem:[#allocation4] sm:$0x1] %vm19_vm2, %v102_v63 }
 0x115   :  { %114 = dma.vmem_to_hbm [thread:$0]  %s110_s1, 16, %s112_s19, [#allocation5]  }
 0x116   :  { %155 = dma.done.wait [#allocation5], 16  }
 0x117   :  { %156 = vsyncadd [#allocation5], 4294967280 }
 0x118   :  { %119 = vsyncpa [#allocation5], 1 }

</bundles_post_ra>
